<compile_context>
chip_gen: v5e
topology: v5e:2x2
jax: 0.10.0
libtpu: 0.0.40
codegen_flags: <defaults>
</compile_context>

<pallas_src>
import functools
import math

import jax
import jax.numpy as jnp
from jax import lax
from jax.experimental import pallas as pl
from jax.experimental.pallas import tpu as pltpu


_NO_MASK = 0
_PER_BATCH = 1   # valid_lens (B,) int32, scalar-prefetched into SMEM
_PER_QUERY = 2   # valid_lens (B, Q, 1) int32, VMEM blocks


# --------------------------------------------------------------------------- #
# Kernels
# --------------------------------------------------------------------------- #
def _flash_attn_kernel(*refs, mask_mode, scale, k_tile):
    """Online-softmax attention over a K-tiled grid (B, n_q, n_k)."""
    if mask_mode != _NO_MASK:
        vl_ref = refs[0]
        q_ref, k_ref, v_ref, o_ref = refs[1:5]
        m_sc, l_sc, acc_sc = refs[5:8]
    else:
        vl_ref = None
        q_ref, k_ref, v_ref, o_ref = refs[0:4]
        m_sc, l_sc, acc_sc = refs[4:7]

    ki = pl.program_id(2)

    @pl.when(ki == 0)
    def _():
        m_sc[...] = jnp.full_like(m_sc, -jnp.inf)
        l_sc[...] = jnp.zeros_like(l_sc)
        acc_sc[...] = jnp.zeros_like(acc_sc)

    # Fold 1/sqrt(d) into q: O(TQ*D) VPU work instead of scaling (TQ, TK) scores.
    q = q_ref[0] * jnp.asarray(scale, dtype=q_ref.dtype)     # (tq, D)
    k = k_ref[0]                                             # (tk, D)
    v = v_ref[0]                                             # (tk, Dv)

    # scores = (q/sqrt(d)) @ k^T without materializing k.T (contract D axes).
    s = lax.dot_general(q, k, (((1,), (1,)), ((), ())),
                        preferred_element_type=jnp.float32)  # (tq, tk)

    if mask_mode != _NO_MASK:
        k_start = ki * k_tile
        col = lax.broadcasted_iota(jnp.int32, (1, s.shape[-1]), 1) + k_start
        if mask_mode == _PER_BATCH:
            vlen = vl_ref[pl.program_id(0)]                  # scalar from SMEM
        else:
            vlen = vl_ref[0]                                 # (tq, 1) from VMEM
        s = jnp.where(col < vlen, s, jnp.float32(-1e6))

    # Online (flash-style) softmax update.
    m_prev = m_sc[...]
    m_new = jnp.maximum(m_prev, jnp.max(s, axis=-1, keepdims=True))
    alpha = jnp.exp(m_prev - m_new)                          # (tq, 1)
    p = jnp.exp(s - m_new)                                   # (tq, tk)
    l_sc[...] = alpha * l_sc[...] + jnp.sum(p, axis=-1, keepdims=True)
    acc_sc[...] = alpha * acc_sc[...] + lax.dot_general(
        p.astype(v.dtype), v, (((1,), (0,)), ((), ())),
        preferred_element_type=jnp.float32)                  # (tq, Dv)
    m_sc[...] = m_new

    @pl.when(ki == pl.num_programs(2) - 1)
    def _():
        inv_l = pl.reciprocal(l_sc[...], approx=True)        # EUP
        o_ref[0] = (acc_sc[...] * inv_l).astype(o_ref.dtype)


def _attn_weights_kernel(*refs, mask_mode, scale):
    """Single-pass attention (full K resident) that also emits softmax weights."""
    if mask_mode != _NO_MASK:
        vl_ref = refs[0]
        q_ref, k_ref, v_ref, o_ref, w_ref = refs[1:6]
    else:
        vl_ref = None
        q_ref, k_ref, v_ref, o_ref, w_ref = refs[0:5]

    q = q_ref[0] * jnp.asarray(scale, dtype=q_ref.dtype)     # (tq, D)
    k = k_ref[0]                                             # (K, D)
    v = v_ref[0]                                             # (K, Dv)

    s = lax.dot_general(q, k, (((1,), (1,)), ((), ())),
                        preferred_element_type=jnp.float32)  # (tq, K)

    if mask_mode != _NO_MASK:
        col = lax.broadcasted_iota(jnp.int32, (1, s.shape[-1]), 1)
        if mask_mode == _PER_BATCH:
            vlen = vl_ref[pl.program_id(0)]                  # scalar from SMEM
        else:
            vlen = vl_ref[0]                                 # (tq, 1)
        s = jnp.where(col < vlen, s, jnp.float32(-1e6))

    m = jnp.max(s, axis=-1, keepdims=True)
    e = jnp.exp(s - m)
    r = pl.reciprocal(jnp.sum(e, axis=-1, keepdims=True), approx=True)

    # Single low-precision cast of e reused for the matmul and weights write
    # (drops one live (tq, K) f32 temporary).
    e_lo = e.astype(v.dtype)
    out = lax.dot_general(e_lo, v, (((1,), (0,)), ((), ())),
                          preferred_element_type=jnp.float32)
    o_ref[0] = (out * r).astype(o_ref.dtype)
    w_ref[0] = (e_lo * r.astype(e_lo.dtype)).astype(w_ref.dtype)


# --------------------------------------------------------------------------- #
# Wrapper
# --------------------------------------------------------------------------- #
def _default_q_tile():
    try:
        kind = jax.devices()[0].device_kind.lower()
    except Exception:
        kind = ""
    # v6e MXU is 2x256x256 -> 256-row tiles; v5e (4x128 MXU) / v7x (64 MiB VMEM) -> 128.
    return 256 if "v6" in kind else 128


def _pick_tile(total, want, unit):
    """Largest multiple of `unit` <= want that divides `total`; else `total`."""
    want = min(want, total)
    if want >= total:
        return total
    t = (want // unit) * unit
    while t >= unit:
        if total % t == 0:
            return t
        t -= unit
    return total


def _vmem_limit_bytes(est_bytes):
    try:
        cap = int(pltpu.get_tpu_info().vmem_capacity_bytes)
    except Exception:
        cap = 64 * 1024 * 1024
    want = max(32 * 1024 * 1024, 4 * int(est_bytes))
    return int(min(cap, want))


def dot_product_attention(queries, keys, values, valid_lens=None, *,
                          return_weights=False, q_tile=None, k_tile=None):
    """Pallas TPU scaled dot-product attention with masked softmax.

    queries: (B, Q, D), keys: (B, K, D), values: (B, K, Dv)
    valid_lens: None, int (B,) per-batch, or int (B, Q) per-query lengths.
    Returns (output (B, Q, Dv), weights (B, Q, K) or None).
    """
    queries = jnp.asarray(queries)
    keys = jnp.asarray(keys)
    values = jnp.asarray(values)

    B, Q, D = queries.shape
    _, K, _ = keys.shape
    Dv = values.shape[-1]
    dtype = queries.dtype
    itemsize = jnp.dtype(dtype).itemsize
    sublane = 16 if dtype == jnp.bfloat16 else 8
    scale = 1.0 / math.sqrt(D)

    # -------- valid_lens classification ------------------------------------
    if valid_lens is None:
        mask_mode = _NO_MASK
        vl = None
    else:
        vl = jnp.asarray(valid_lens, jnp.int32)
        if vl.ndim == 1:
            if vl.shape[0] != B:
                raise ValueError(f"1-D valid_lens must have shape ({B},), got {vl.shape}")
            mask_mode = _PER_BATCH                      # scalar-prefetched SMEM
        elif vl.ndim == 2:
            if vl.shape != (B, Q):
                raise ValueError(f"2-D valid_lens must have shape ({B},{Q}), got {vl.shape}")
            mask_mode = _PER_QUERY
            vl = vl.reshape(B, Q, 1)
        else:
            raise ValueError("valid_lens must be None, 1-D, or 2-D")

    # -------- tile selection (dividing tiles only, sublane-aligned) ---------
    tq = _pick_tile(Q, _default_q_tile() if q_tile is None else q_tile, sublane)
    tk = _pick_tile(K, 512 if k_tile is None else k_tile, sublane)
    n_q = Q // tq
    n_k = K // tk

    flops = 2 * B * Q * K * (D + Dv)
    transcendentals = B * Q * K
    bytes_accessed = (queries.size + keys.size + values.size + B * Q * Dv) * itemsize
    if return_weights:
        bytes_accessed += B * Q * K * itemsize
    if vl is not None:
        bytes_accessed += int(vl.size) * 4
    cost = pl.CostEstimate(flops=int(flops),
                           transcendentals=int(transcendentals),
                           bytes_accessed=int(bytes_accessed))

    num_prefetch = 1 if mask_mode == _PER_BATCH else 0

    if not return_weights:
        # ---------------- flash path: K-tiled online softmax ----------------
        grid = (B, n_q, n_k)

        inputs = []
        in_specs = []
        if mask_mode == _PER_BATCH:
            inputs.append(vl)                                  # SMEM prefetch, no spec
        elif mask_mode == _PER_QUERY:
            inputs.append(vl)
            in_specs.append(pl.BlockSpec((1, tq, 1), lambda b, qi, ki, *_: (b, qi, 0)))
        inputs += [queries, keys, values]
        in_specs += [
            pl.BlockSpec((1, tq, D), lambda b, qi, ki, *_: (b, qi, 0)),
            pl.BlockSpec((1, tk, D), lambda b, qi, ki, *_: (b, ki, 0)),
            pl.BlockSpec((1, tk, Dv), lambda b, qi, ki, *_: (b, ki, 0)),
        ]
        out_spec = pl.BlockSpec((1, tq, Dv), lambda b, qi, ki, *_: (b, qi, 0))
        out_shape = jax.ShapeDtypeStruct((B, Q, Dv), dtype)
        scratch = [pltpu.VMEM((tq, 1), jnp.float32),
                   pltpu.VMEM((tq, 1), jnp.float32),
                   pltpu.VMEM((tq, Dv), jnp.float32)]

        est = (2 * (tq * D + tk * D + tk * Dv) * itemsize     # double-buffered inputs
               + 2 * tq * Dv * itemsize                        # output double buffer
               + (tq * Dv + 2 * tq) * 4                        # scratch
               + 3 * tq * tk * 4)                              # score/p temporaries
        if mask_mode == _PER_QUERY:
            est += 2 * tq * 4

        kernel = functools.partial(_flash_attn_kernel, mask_mode=mask_mode,
                                   scale=scale, k_tile=tk)
        out = pl.pallas_call(
            kernel,
            grid_spec=pltpu.PrefetchScalarGridSpec(
                num_scalar_prefetch=num_prefetch, grid=grid,
                in_specs=in_specs, out_specs=out_spec, scratch_shapes=scratch),
            out_shape=out_shape,
            compiler_params=pltpu.CompilerParams(
                dimension_semantics=("parallel", "arbitrary", "arbitrary"),
                vmem_limit_bytes=_vmem_limit_bytes(est)),
            cost_estimate=cost,
        )(*inputs)
        return out, None

    # ---------------- opt-in weights path: full K resident ------------------
    grid = (B, n_q)

    inputs = []
    in_specs = []
    if mask_mode == _PER_BATCH:
        inputs.append(vl)                                      # SMEM prefetch
    elif mask_mode == _PER_QUERY:
        inputs.append(vl)
        in_specs.append(pl.BlockSpec((1, tq, 1), lambda b, qi, *_: (b, qi, 0)))
    inputs += [queries, keys, values]
    in_specs += [
        pl.BlockSpec((1, tq, D), lambda b, qi, *_: (b, qi, 0)),
        # K/V indexed only by b -> stay resident across the Q-tile axis.
        pl.BlockSpec((1, K, D), lambda b, qi, *_: (b, 0, 0)),
        pl.BlockSpec((1, K, Dv), lambda b, qi, *_: (b, 0, 0)),
    ]
    out_shapes = (jax.ShapeDtypeStruct((B, Q, Dv), dtype),
                  jax.ShapeDtypeStruct((B, Q, K), dtype))
    out_specs = (pl.BlockSpec((1, tq, Dv), lambda b, qi, *_: (b, qi, 0)),
                 pl.BlockSpec((1, tq, K), lambda b, qi, *_: (b, qi, 0)))

    est = (2 * (tq * D + K * D + K * Dv) * itemsize
           + 2 * (tq * Dv + tq * K) * itemsize
           + 3 * tq * K * 4)
    if mask_mode == _PER_QUERY:
        est += 2 * tq * 4

    kernel = functools.partial(_attn_weights_kernel, mask_mode=mask_mode, scale=scale)
    out, weights = pl.pallas_call(
        kernel,
        grid_spec=pltpu.PrefetchScalarGridSpec(
            num_scalar_prefetch=num_prefetch, grid=grid,
            in_specs=in_specs, out_specs=out_specs),
        out_shape=out_shapes,
        compiler_params=pltpu.CompilerParams(
            dimension_semantics=("parallel", "arbitrary"),
            vmem_limit_bytes=_vmem_limit_bytes(est)),
        cost_estimate=cost,
    )(*inputs)
    return out, weights


# --------------------------------------------------------------------------- #
# Pure-JAX reference + tests
# --------------------------------------------------------------------------- #
def _reference(queries, keys, values, valid_lens):
    d = queries.shape[-1]
    scores = jnp.einsum("bqd,bkd->bqk", queries, keys) / math.sqrt(d)
    if valid_lens is not None:
        vl = jnp.asarray(valid_lens)
        if vl.ndim == 1:
            vl = vl[:, None]
        col = jnp.arange(scores.shape[-1])[None, None, :]
        mask = col < vl[:, :, None]
        scores = jnp.where(mask, scores, -1e6)
    w = jax.nn.softmax(scores, axis=-1)
    return jnp.einsum("bqk,bkv->bqv", w, values), w


if __name__ == "__main__":
    # Tolerance: pl.reciprocal(approx=True) has ~1e-4 relative error.
    TOL = dict(atol=2e-3, rtol=2e-3)

    key = jax.random.PRNGKey(0)
    kq, kk, kv = jax.random.split(key, 3)

    # --- small d2l-style shapes ------------------------------------------------
    B, Q, K, D, Dv = 2, 8, 8, 32, 32
    queries = jax.random.normal(kq, (B, Q, D), dtype=jnp.float32)
    keys = jax.random.normal(kk, (B, K, D), dtype=jnp.float32)
    values = jax.random.normal(kv, (B, K, Dv), dtype=jnp.float32)

    # 1-D (per-batch) valid_lens, opt-in weights path
    valid_lens = jnp.array([3, 6], dtype=jnp.int32)
    out, weights = dot_product_attention(queries, keys, values, valid_lens,
                                         return_weights=True)
    out = jax.block_until_ready(out)
    weights = jax.block_until_ready(weights)
    ref_out, ref_w = _reference(queries, keys, values, valid_lens)
    assert jnp.allclose(out, ref_out, **TOL), "output mismatch (1-D valid_lens, weights path)"
    assert jnp.allclose(weights, ref_w, **TOL), "weights mismatch (1-D valid_lens)"

    # 2-D (per-query) valid_lens, opt-in weights path
    valid_lens_2d = jnp.array([[1, 2, 3, 4, 5, 6, 7, 8],
                               [8, 7, 6, 5, 4, 3, 2, 1]], dtype=jnp.int32)
    out2d, w2d = dot_product_attention(queries, keys, values, valid_lens_2d,
                                       return_weights=True)
    jax.block_until_ready(out2d)
    ref_out2d, ref_w2d = _reference(queries, keys, values, valid_lens_2d)
    assert jnp.allclose(out2d, ref_out2d, **TOL), "output mismatch (2-D valid_lens, weights path)"
    assert jnp.allclose(w2d, ref_w2d, **TOL), "weights mismatch (2-D valid_lens)"

    # Default (flash) path, 1-D valid_lens, no weights writeback
    out_f, w_f = dot_product_attention(queries, keys, values, valid_lens)
    jax.block_until_ready(out_f)
    assert w_f is None
    assert jnp.allclose(out_f, ref_out, **TOL), "output mismatch (flash, 1-D valid_lens)"

    # Default (flash) path, unmasked
    out_n, _ = dot_product_attention(queries, keys, values, None)
    jax.block_until_ready(out_n)
    ref_n, _ = _reference(queries, keys, values, None)
    assert jnp.allclose(out_n, ref_n, **TOL), "output mismatch (flash, unmasked)"

    # --- larger shapes that exercise real Q/K tiling (online softmax) -----------
    B2, Q2, K2, D2, Dv2 = 2, 64, 128, 32, 32
    k1, k2, k3 = jax.random.split(jax.random.PRNGKey(1), 3)
    q2 = jax.random.normal(k1, (B2, Q2, D2), dtype=jnp.float32)
    kk2 = jax.random.normal(k2, (B2, K2, D2), dtype=jnp.float32)
    vv2 = jax.random.normal(k3, (B2, K2, Dv2), dtype=jnp.float32)

    vl_b = jnp.array([37, 128], dtype=jnp.int32)
    out_t, _ = dot_product_attention(q2, kk2, vv2, vl_b, q_tile=16, k_tile=32)
    jax.block_until_ready(out_t)
    ref_t, _ = _reference(q2, kk2, vv2, vl_b)
    assert jnp.allclose(out_t, ref_t, **TOL), "output mismatch (flash tiled, 1-D valid_lens)"

    vl_q = jnp.broadcast_to(
        jnp.minimum(jnp.arange(1, Q2 + 1, dtype=jnp.int32)[None, :] * 2, K2), (B2, Q2))
    out_t2, _ = dot_product_attention(q2, kk2, vv2, vl_q, q_tile=16, k_tile=32)
    jax.block_until_ready(out_t2)
    ref_t2, _ = _reference(q2, kk2, vv2, vl_q)
    assert jnp.allclose(out_t2, ref_t2, **TOL), "output mismatch (flash tiled, 2-D valid_lens)"

    out_t3, _ = dot_product_attention(q2, kk2, vv2, None, q_tile=16, k_tile=32)
    jax.block_until_ready(out_t3)
    ref_t3, _ = _reference(q2, kk2, vv2, None)
    assert jnp.allclose(out_t3, ref_t3, **TOL), "output mismatch (flash tiled, unmasked)"

    print("KERNEL_OK")
</pallas_src>

<mosaic_0001>
module attributes {stable_mosaic.version = 11 : i64} {
  func.func @_attn_weights_kernel(%arg0: i32, %arg1: i32, %arg2: memref<2xi32, #tpu.memory_space<smem>>, %arg3: memref<1x8x32xf32, #tpu.memory_space<vmem>>, %arg4: memref<1x8x32xf32, #tpu.memory_space<vmem>>, %arg5: memref<1x8x32xf32, #tpu.memory_space<vmem>>, %arg6: memref<1x8x32xf32, #tpu.memory_space<vmem>>, %arg7: memref<1x8x8xf32, #tpu.memory_space<vmem>>) attributes {dimension_semantics = [#tpu.dimension_semantics<parallel>, #tpu.dimension_semantics<arbitrary>], iteration_bounds = array<i64: 2, 1>, scalar_prefetch = 1 : i64, scratch_operands = 0 : i64, tpu.core_type = #tpu.core_type<tc>, window_params = [{transform_indices = @transform_0, window_bounds = array<i64: 1, 8, 32>}, {transform_indices = @transform_1, window_bounds = array<i64: 1, 8, 32>}, {transform_indices = @transform_2, window_bounds = array<i64: 1, 8, 32>}, {transform_indices = @transform_3, window_bounds = array<i64: 1, 8, 32>}, {transform_indices = @transform_4, window_bounds = array<i64: 1, 8, 8>}]} {
    %c0 = arith.constant 0 : index
    %c0_0 = arith.constant 0 : index
    %c0_1 = arith.constant 0 : index
    %0 = vector.load %arg3[%c0, %c0_0, %c0_1] : memref<1x8x32xf32, #tpu.memory_space<vmem>>, vector<1x8x32xf32>
    %1 = vector.shape_cast %0 : vector<1x8x32xf32> to vector<8x32xf32>
    %cst = arith.constant 0.176776692 : f32
    %2 = vector.broadcast %cst : f32 to vector<8x32xf32>
    %3 = arith.mulf %1, %2 : vector<8x32xf32>
    %c0_2 = arith.constant 0 : index
    %c0_3 = arith.constant 0 : index
    %c0_4 = arith.constant 0 : index
    %4 = vector.load %arg4[%c0_2, %c0_3, %c0_4] : memref<1x8x32xf32, #tpu.memory_space<vmem>>, vector<1x8x32xf32>
    %5 = vector.shape_cast %4 : vector<1x8x32xf32> to vector<8x32xf32>
    %c0_5 = arith.constant 0 : index
    %c0_6 = arith.constant 0 : index
    %c0_7 = arith.constant 0 : index
    %6 = vector.load %arg5[%c0_5, %c0_6, %c0_7] : memref<1x8x32xf32, #tpu.memory_space<vmem>>, vector<1x8x32xf32>
    %7 = vector.shape_cast %6 : vector<1x8x32xf32> to vector<8x32xf32>
    %cst_8 = arith.constant dense<0.000000e+00> : vector<8x8xf32>
    %8 = tpu.matmul %3, %5, %cst_8 {dimension_numbers = #tpu.dot_dimension_numbers<[1], [1], [0], [0], [0, 0, 1, 0], [], []>} : vector<8x32xf32>, vector<8x32xf32>, vector<8x8xf32> -> vector<8x8xf32>
    %9 = tpu.iota {dimensions = array<i32: 1>} : vector<1x8xi32>
    %10 = arith.index_cast %arg0 : i32 to index
    %11 = memref.load %arg2[%10] : memref<2xi32, #tpu.memory_space<smem>>
    %12 = vector.broadcast %11 : i32 to vector<1x8xi32>
    %13 = arith.cmpi slt, %9, %12 : vector<1x8xi32>
    %cst_9 = arith.constant -1.000000e+06 : f32
    %14 = vector.shape_cast %13 : vector<1x8xi1> to vector<1x8xi1>
    %15 = vector.broadcast %14 : vector<1x8xi1> to vector<8x8xi1>
    %16 = vector.broadcast %cst_9 : f32 to vector<8x8xf32>
    %17 = arith.select %15, %8, %16 : vector<8x8xi1>, vector<8x8xf32>
    %cst_10 = arith.constant dense<0xFF800000> : vector<8xf32>
    %18 = vector.multi_reduction <maximumf>, %17, %cst_10 [1] : vector<8x8xf32> to vector<8xf32>
    %19 = vector.shape_cast %18 : vector<8xf32> to vector<8x1xf32>
    %20 = vector.broadcast %19 : vector<8x1xf32> to vector<8x8xf32>
    %21 = arith.subf %17, %20 : vector<8x8xf32>
    %22 = math.exp %21 : vector<8x8xf32>
    %cst_11 = arith.constant dense<0.000000e+00> : vector<8xf32>
    %23 = vector.multi_reduction <add>, %22, %cst_11 [1] : vector<8x8xf32> to vector<8xf32>
    %24 = vector.shape_cast %23 : vector<8xf32> to vector<8x1xf32>
    %25 = tpu.reciprocal %24 {approx = true} : vector<8x1xf32> -> vector<8x1xf32>
    %cst_12 = arith.constant dense<0.000000e+00> : vector<8x32xf32>
    %26 = tpu.matmul %22, %7, %cst_12 {dimension_numbers = #tpu.dot_dimension_numbers<[1], [0], [0], [1], [0, 0, 1, 1], [], []>} : vector<8x8xf32>, vector<8x32xf32>, vector<8x32xf32> -> vector<8x32xf32>
    %27 = vector.broadcast %25 : vector<8x1xf32> to vector<8x32xf32>
    %28 = arith.mulf %26, %27 : vector<8x32xf32>
    %c0_13 = arith.constant 0 : index
    %c0_14 = arith.constant 0 : index
    %c0_15 = arith.constant 0 : index
    %29 = vector.load %arg6[%c0_13, %c0_14, %c0_15] : memref<1x8x32xf32, #tpu.memory_space<vmem>>, vector<1x8x32xf32>
    %30 = vector.shape_cast %29 : vector<1x8x32xf32> to vector<8x32xf32>
    %31 = vector.shape_cast %28 : vector<8x32xf32> to vector<1x8x32xf32>
    tpu.vector_store %arg6[%c0_13, %c0_14, %c0_15], %31 {strides = array<i32>} : memref<1x8x32xf32, #tpu.memory_space<vmem>>, vector<1x8x32xf32>,
    %32 = vector.broadcast %25 : vector<8x1xf32> to vector<8x8xf32>
    %33 = arith.mulf %22, %32 : vector<8x8xf32>
    %c0_16 = arith.constant 0 : index
    %c0_17 = arith.constant 0 : index
    %c0_18 = arith.constant 0 : index
    %34 = vector.load %arg7[%c0_16, %c0_17, %c0_18] : memref<1x8x8xf32, #tpu.memory_space<vmem>>, vector<1x8x8xf32>
    %35 = vector.shape_cast %34 : vector<1x8x8xf32> to vector<8x8xf32>
    %36 = vector.shape_cast %33 : vector<8x8xf32> to vector<1x8x8xf32>
    tpu.vector_store %arg7[%c0_16, %c0_17, %c0_18], %36 {strides = array<i32>} : memref<1x8x8xf32, #tpu.memory_space<vmem>>, vector<1x8x8xf32>,
    return
  }
  func.func @transform_0(%arg0: i32, %arg1: i32, %arg2: memref<2xi32, #tpu.memory_space<smem>>) -> (i32, i32, i32) {
    %c0_i32 = arith.constant 0 : i32
    %c0_i32_0 = arith.constant 0 : i32
    return %arg0, %arg1, %c0_i32 : i32, i32, i32
  }
  func.func @transform_1(%arg0: i32, %arg1: i32, %arg2: memref<2xi32, #tpu.memory_space<smem>>) -> (i32, i32, i32) {
    %c0_i32 = arith.constant 0 : i32
    %c0_i32_0 = arith.constant 0 : i32
    %c0_i32_1 = arith.constant 0 : i32
    return %arg0, %c0_i32, %c0_i32_0 : i32, i32, i32
  }
  func.func @transform_2(%arg0: i32, %arg1: i32, %arg2: memref<2xi32, #tpu.memory_space<smem>>) -> (i32, i32, i32) {
    %c0_i32 = arith.constant 0 : i32
    %c0_i32_0 = arith.constant 0 : i32
    %c0_i32_1 = arith.constant 0 : i32
    return %arg0, %c0_i32, %c0_i32_0 : i32, i32, i32
  }
  func.func @transform_3(%arg0: i32, %arg1: i32, %arg2: memref<2xi32, #tpu.memory_space<smem>>) -> (i32, i32, i32) {
    %c0_i32 = arith.constant 0 : i32
    %c0_i32_0 = arith.constant 0 : i32
    return %arg0, %arg1, %c0_i32 : i32, i32, i32
  }
  func.func @transform_4(%arg0: i32, %arg1: i32, %arg2: memref<2xi32, #tpu.memory_space<smem>>) -> (i32, i32, i32) {
    %c0_i32 = arith.constant 0 : i32
    %c0_i32_0 = arith.constant 0 : i32
    return %arg0, %arg1, %c0_i32 : i32, i32, i32
  }
}

</mosaic_0001>

<bundles_post_ra>
// kernel: tpu_custom_call.1
= control target key start
LH: loop header
LB: loop body
LE: loop exit
PB: predicated region body
PF: predicated region fallthrough
CT: control target
= control target key end

     0   :  { %s931_s21 = smov [#allocation3]   ;;  %s1158_s0 = inlined_call_operand.hbm [shape: s32[2], index: 0, kind: input, shape index: {}]   ;;  %s1159_s1 = inlined_call_operand.hbm [shape: f32[2,8,32], index: 1, kind: input, shape index: {}]   ;;  %s1160_s2 = inlined_call_operand.hbm [shape: f32[2,8,32], index: 2, kind: input, shape index: {}]   ;;  %s1161_s3 = inlined_call_operand.hbm [shape: f32[2,8,32], index: 3, kind: input, shape index: {}]   ;;  %s1162_s4 = inlined_call_operand.hbm [shape: f32[2,8,32], index: 4, kind: output, shape index: {0}]   ;;  %s1163_s5 = inlined_call_operand.hbm [shape: f32[2,8,8], index: 5, kind: output, shape index: {1}]  }
   0x1   :  { %1167 = sst [smem:[#allocation22_spill]] %s1160_s2  ;;  %s12_s20 = sshll.u32 %s1158_s0, 4  ;;  %s13_s20 = int_to_ptr.hbm [resolvable:$true] %s12_s20 }
   0x2   :  { %15 = dma.hbm_to_smem %s13_s20, 16, %s931_s21, [#allocation2] }
   0x3   :  { %889 = dma.done.wait [#allocation2], 16 }
   0x4   :  { %890 = vsyncadd [#allocation2], 4294967280 }
   0x5   :  { %18 = sfence }
   0x6   :  { %19 = vsyncpa [#allocation5], 0 }
   0x7   :  { %21 = vsyncpa [#allocation5 + $0x1], 0 }
   0x8   :  { %22 = vsyncpa [#allocation8], 0 }
   0x9   :  { %24 = vsyncpa [#allocation8 + $0x1], 0 }
   0xa   :  { %25 = vsyncpa [#allocation6], 0 }
   0xb   :  { %27 = vsyncpa [#allocation6 + $0x1], 0 }
   0xc   :  { %28 = vsyncpa [#allocation12], 0 }
   0xd   :  { %30 = vsyncpa [#allocation12 + $0x1], 0  ;;  %s965_s22 = smov 0   ;;  %s967_s23 = smov 0  }
   0xe   :  { %s969_s24 = smov 0   ;;  %s971_s0 = smov 0  }
   0xf   :  { %s973_s25 = smov 0   ;;  %s975_s26 = smov 0  }
  0x10 LB: > { %1168 = sst [smem:[#allocation18_spill]] %s917_s24  ;;  %s996_s27 = sadd.s32 4294967295, %s929_s26   ;;  %s929_s26 = sphi %s975_s26, %s36_s26   ;;  %s925_s25 = sphi %s973_s25, %s1182_s25   ;;  %s921_s0 = sphi %s971_s0, %s1181_s0   ;;  %s917_s24 = sphi %s969_s24, %s1180_s24   ;;  %s913_s23 = sphi %s967_s23, %s1184_s23   ;;  %s909_s22 = sphi %s965_s22, %s1183_s22  }
  0x11   : > { %1169 = sst [smem:[#allocation19_spill]] %s925_s25  ;;  %s601_s28 = sadd.s32 4294967294, %s929_s26  }
  0x12   : > { %s48_s29 = sadd.s32 1, %s925_s25  ;;  %s57_s30 = sadd.s32 1, %s917_s24 }
  0x13   : > { %p50_p0 = scmp.ge.s32.totalorder %s48_s29, 2  ;;  %p64_p1 = scmp.ne.s32.totalorder %s917_s24, %s913_s23 }
  0x14   : > { %p65_p2 = scmp.eq.s32.totalorder %s929_s26, 0  ;;  %p70_p3 = scmp.ne.s32.totalorder %s913_s23, %s909_s22 }
  0x15   : > { %s1186_s29 = smov (%p50_p0, %s48_s29), 0  ;;  %p71_p5 = scmp.eq.s32.totalorder %s996_s27, 0 }
  0x16   : > { %1170 = sst [smem:[#allocation20_spill]] %s1186_s29  ;;  %p1008_p4 = por %p65_p2, %p64_p1 }
  0x17   : > { %s52_s7 = ssub.s32 %s925_s25, %s1186_s29  ;;  %p148_p6 = scmp.eq.s32.totalorder %s996_s27, 1 }
  0x18   : > { %p55_p7 = scmp.eq.s32.totalorder %s52_s7, 0  ;;  %p1016_p8 = por %p71_p5, %p70_p3 }
  0x19   : > { %p1020_p9 = por %p148_p6, %p64_p1  ;;  %p154_p10 = scmp.eq.s32.totalorder %s601_s28, 1 }
  0x1a   : > { %s1025_s10 = scalar_select %p55_p7, %s917_s24, %s57_s30  }
  0x1b   : > { %p1027_p11 = por %p154_p10, %p70_p3  ;;  %p603_p12 = scmp.ge.s32.totalorder %s929_s26, 2 }
  0x1c   : > { %1174 = sst [smem:[#allocation21_spill]] %s1025_s10  ;;  %p652_p13 = scmp.lt.s32.totalorder %s929_s26, 2 }
  0x1d   : > { %s202_s12 = sand.u32 1, %s917_s24   ;;  %s605_s14 = sshll.u32 %s925_s25, 3 }
  0x1e   : > { %s604_s13 = sshll.u32 %s202_s12, 3  ;;  %p1037_p0 = pnand %p652_p13, %p1008_p4 }
  0x1f   : > { %s222_s16 = sand.u32 1, %s929_s26   ;;  %s1177_s2 = sld [smem:[#allocation22_spill]] }
  0x20   : > { %s226_s21 = scalar_lea.vmem [#allocation7], %s604_s13  ;;  %s223_s30 = scalar_lea.sflag [#allocation8], %s222_s16 }
  0x21   : > { %s234_s28 = sshll.u32 %s226_s21, 4  ;;  %p610_p1 = scmp.ge.s32.totalorder %s929_s26, 1  ;;  %s235_s28 = int_to_ptr.vmem [resolvable:$true] %s234_s28 }
  0x22   : > { %p258_p2 = scmp.lt.s32.totalorder %s929_s26, 3  ;;  %s211_s17 = scalar_lea.hbm %s1159_s1, %s605_s14 }
  0x23   : > { %s213_s18 = sshll.u32 %s211_s17, 4  ;;  %s203_s21 = scalar_lea.sflag [#allocation5], %s202_s12  ;;  %s214_s18 = int_to_ptr.hbm [resolvable:$true] %s213_s18 }
  0x24   : > { %p1049_p3 = pnand %p610_p1, %p258_p2  ;;  %s245_s10 = scalar_lea.vmem [#allocation9], %s604_s13 }
  0x25   : > { %s230_s19 = scalar_lea.hbm %s1177_s2, %s605_s14  ;;  %s253_s24 = sshll.u32 %s245_s10, 4  ;;  %s254_s24 = int_to_ptr.vmem [resolvable:$true] %s253_s24 }
  0x26   : > { %s232_s20 = sshll.u32 %s230_s19, 4  ;;  %s206_s19 = scalar_lea.vmem [#allocation4], %s604_s13  ;;  %s233_s20 = int_to_ptr.hbm [resolvable:$true] %s232_s20 }
  0x27   : > { %641 = dma.hbm_to_vmem [thread:$0]  (!%p1037_p0), %s233_s20, 128, %s235_s28, %s223_s30  }
  0x28   : > { %s215_s2 = sshll.u32 %s206_s19, 4  ;;  %s249_s28 = scalar_lea.hbm %s1161_s3, %s605_s14  ;;  %s216_s2 = int_to_ptr.vmem [resolvable:$true] %s215_s2 }
  0x29   : > { %638 = dma.hbm_to_vmem [thread:$0]  (!%p1037_p0), %s214_s18, 128, %s216_s2, %s203_s21  }
  0x2a   : > { %s251_s25 = sshll.u32 %s249_s28, 4  ;;  %262 = sbr.rel (%p1049_p3) target bundleno = 451 (0x1c3), region = 32  ;;  %s252_s25 = int_to_ptr.hbm [resolvable:$true] %s251_s25 }
  0x2b   : > { %644 = dma.hbm_to_vmem [thread:$0]  (!%p1037_p0), %s252_s25, 128, %s254_s24, %s223_s30  }
  0x2c   : > { %s1066_s29 = sand.u32 (!%p1049_p3), 1, %s913_s23  }
  0x2d   : > { %s1069_s2 = sshll.u32 (!%p1049_p3), %s1066_s29, 3  ;;  %s265_s12 = scalar_lea.sflag (!%p1049_p3), [#allocation5], %s1066_s29 }
  0x2e   : > { %s268_s14 = scalar_lea.vmem (!%p1049_p3), [#allocation4], %s1069_s2 }
  0x2f   : > { %892 = dma.done.wait (%p1016_p8), %s265_s12, 128  }
  0x30   : > { %894 = vsyncadd (%p1016_p8), %s265_s12, 4294967168  ;;  %s274_s24 = sand.u32 1, %s996_s27   ;;  %s278_s10 = scalar_lea.vmem [#allocation7], %s1069_s2 }
  0x31   : > { %s275_s25 = scalar_lea.sflag [#allocation8], %s274_s24 }
  0x32   : > { %896 = dma.done.wait (%p1016_p8), %s275_s25, 256  }
  0x33   : > { %898 = vsyncadd (%p1016_p8), %s275_s25, 4294967040  ;;  %vm333_vm0 = vcmask 261120   ;;  %v331_v0 = vld [vmem:[%s278_s10] sm:$0xff]  ;;  %v329_v1 = vld [vmem:[%s268_s14] sm:$0xff]  ;;  %s362_s13 = sld [smem:[#allocation3 + %s921_s0]]  ;;  %v360_v3 = vlaneseq  ;;  %vm368_vm2 = vcmask 64512  }
  0x34   : > { %616 = vmatpush.xpose.msk.msra.mxu0 %vm333_vm0, %v331_v0  ;;  %v330_v2 = vmul.f32 0.17677669, %v329_v1  ;;  %s288_s27 = scalar_lea.vmem [#allocation9], %s1069_s2  ;;  %s621_s8 = sshll.u32 %s921_s0, 3 }
  0x35   : > { %v361_v4 = vand.u32 127, %v360_v3  ;;  %v332_v9 = vld [vmem:[%s288_s27] sm:$0xff]  ;;  %s438_s6 = scalar_lea.hbm %s1163_s5, %s621_s8  ;;  %s423_s18 = scalar_lea.hbm %s1162_s4, %s621_s8 }
  0x36   : > { %397 = vmatpush.msra.mxu1 %v332_v9  ;;  %s328_s19 = scalar_lea.vmem [#allocation11], %s1069_s2  ;;  %s442_s16 = sshll.u32 %s438_s6, 4  ;;  %s443_s16 = int_to_ptr.hbm [resolvable:$true] %s442_s16 }
  0x37   : > { %617 = vmatmul.msk.f32.vlgmr.msra.gmra.mxu0 %vm333_vm0, %v330_v2  ;;  %s1098_s21 = sshll.u32 %s328_s19, 4  ;;  %s321_s20 = scalar_lea.vmem [#allocation10], %s1069_s2  ;;  %s441_s21 = int_to_ptr.vmem [resolvable:$true] %s1098_s21 }
  0x38   : > { %s1101_s28 = sshll.u32 %s321_s20, 4  ;;  %s427_s0 = sshll.u32 %s423_s18, 4  ;;  %s426_s28 = int_to_ptr.vmem [resolvable:$true] %s1101_s28  ;;  %s1105_s0 = int_to_ptr.hbm [resolvable:$true] %s427_s0 }
  0x39   : > { %v363_v5 = vstv %s362_s13  ;;  %s412_s12 = scalar_lea.sflag [#allocation12], %s1066_s29  ;;  %s823_s14 = sshra.s32 %s443_s16, 4  ;;  %s824_s14 = int_to_ptr.hbm [resolvable:$true] %s823_s14 }
  0x3a   : > { %vm364_vm1 = vcmp.lt.s32.totalorder %v361_v4, %v363_v5  ;;  %s825_s2 = scalar_lea.hbm %s824_s14, 8  ;;  %s829_s10 = scalar_lea.hbm %s1163_s5, 16 }
  0x3b   : > { %p826_p4 = scmp.ne.s32.totalorder %s824_s14, %s825_s2  ;;  %p830_p7 = scmp.lt.s32.totalorder %s824_s14, %s1163_s5 }
  0x3c   : > { %p831_p8 = scmp.lt.s32.totalorder %s829_s10, %s825_s2 }
  0x3d   : > { %p827_p5 = pnand %p826_p4, %p1020_p9 }
  0x3e   : > { %p832_p10 = por %p831_p8, %p830_p7 }
  0x3f   : > { %p828_p6 = pneg %p827_p5 }
  0x41   : > { %p833_p13 = pnand %p832_p10, %p828_p6 }
  0xb4   : > { %v357_v6 = vpop.f32.mrf.mxu0 }
  0xb5   : > { %v367_v7 = vsel %vm364_vm1, %v357_v6, -1000000.0 }
  0xb6   : > { %v369_v8 = vsel %vm368_vm2, %v367_v7, -inf }
  0xb7   : > { %370 = vmax.xlane.f32.xlu0 %v369_v8 }
 0x12a   : > { %v371_v10 = vpop.xlane.xlu0 %370 }
 0x12b   : > { %v372_v11 = vsub.f32 %v367_v7, %v371_v10 }
 0x12d   : > { %v373_v12 = vmul.f32 1.442695, %v372_v11 }
 0x12f   : > { %703 = vpow2.f32 %v373_v12 }
 0x135   : > { %v704_v13 = vpop.eup %703 }
 0x136   : > { %618 = vmatmul.msk.f32.vlgmr.msra.gmra.mxu1 %vm368_vm2, %v704_v13  ;;  %v375_v14 = vsel %vm368_vm2, %v704_v13, 0.0 }
 0x137   : > { %376 = vadd.xlane.f32.xlu0 %v375_v14 }
 0x1aa   : > { %v377_v15 = vpop.xlane.xlu0 %376 }
 0x1ab   : > { %705 = vrcp.f32 %v377_v15 }
 0x1b1   : > { %v706_v16 = vpop.eup %705 }
 0x1b2   : > { %v404_v17 = vmul.f32 %v706_v16, %v704_v13 }
 0x1b3   : > { %v399_v18 = vpop.f32.mrf.mxu1 }
 0x1b4   : > { %v402_v19 = vmul.f32 %v706_v16, %v399_v18  ;;  %405 = vst.msk [vmem:[%s328_s19] sm:$0xff] %vm368_vm2, %v404_v17 }
 0x1b5   : > { %836 = shalt.err (!%p833_p13)
}
 0x1b6   : > { %632 = dma.vmem_to_hbm [thread:$0]  (%p1020_p9), %s441_s21, 128, %s443_s16, %s412_s12   ;;  %403 = vst.msk [vmem:[%s321_s20] sm:$0xff] %vm333_vm0, %v402_v19 }
 0x1b7   : > { %s407_s8 = scalar_lea.sflag [#allocation6], %s1066_s29  ;;  %s851_s15 = sshra.s32 %s1105_s0, 4  ;;  %s852_s15 = int_to_ptr.hbm [resolvable:$true] %s851_s15 }
 0x1b8   : > { %s853_s30 = scalar_lea.hbm %s852_s15, 8  ;;  %s857_s17 = scalar_lea.hbm %s1162_s4, 16 }
 0x1b9   : > { %p854_p0 = scmp.ne.s32.totalorder %s852_s15, %s853_s30  ;;  %p858_p3 = scmp.lt.s32.totalorder %s852_s15, %s1162_s4 }
 0x1ba   : > { %p859_p4 = scmp.lt.s32.totalorder %s857_s17, %s853_s30 }
 0x1bb   : > { %p855_p1 = pnand %p854_p0, %p1020_p9 }
 0x1bc   : > { %p860_p5 = por %p859_p4, %p858_p3 }
 0x1bd   : > { %p856_p2 = pneg %p855_p1 }
 0x1bf   : > { %p861_p6 = pnand %p860_p5, %p856_p2 }
 0x1c1   : > { %864 = shalt.err (!%p861_p6)
}
 0x1c2   : > { %631 = dma.vmem_to_hbm [thread:$0]  (%p1020_p9), %s426_s28, 128, %s1105_s0, %s407_s8  }
 0x1c3 PF: > { %s454_s29 = sand.u32 1, %s909_s22   ;;  %p646_p7 = pnand %p603_p12, %p1027_p11 }
 0x1c4   : > { %s455_s21 = scalar_lea.sflag [#allocation6], %s454_s29 }
 0x1c5   : > { %p647_p8 = pneg %p646_p7 }
 0x1c7   : > { %900 = dma.done.wait (%p647_p8), %s455_s21, 128  }
 0x1c8   : > { %902 = vsyncadd (%p647_p8), %s455_s21, 4294967168  ;;  %s465_s16 = scalar_lea.sflag [#allocation12], %s454_s29 }
 0x1c9   : > { %904 = dma.done.wait (%p647_p8), %s465_s16, 128  }
 0x1ca   : > { %906 = vsyncadd (%p647_p8), %s465_s16, 4294967168  ;;  %s36_s26 = sadd.s32 1, %s929_s26   ;;  %s1179_s9 = sld [smem:[#allocation18_spill]] }
 0x1cb   : > { %p33_p10 = scmp.ge.s32.totalorder %s36_s26, 4   ;;  %s1180_s24 = sld [smem:[#allocation21_spill]] }
 0x1cc   : > { %s1181_s0 = sld [smem:[#allocation19_spill]]  ;;  %s1183_s22 = smov %s913_s23 }
 0x1cd   : > { %s1182_s25 = sld [smem:[#allocation20_spill]]  ;;  %35 = sbr.rel (!%p33_p10) target bundleno = 16 (0x10), region = 118 }
 0x1d0   : > { %s1184_s23 = smov %s1179_s9 }
 0x1d2   :  { %471 = vsyncpa [#allocation5], 1 }
 0x1d3   :  { %473 = vsyncpa [#allocation5 + $0x1], 1 }
 0x1d4   :  { %474 = vsyncpa [#allocation8], 1 }
 0x1d5   :  { %476 = vsyncpa [#allocation8 + $0x1], 1 }
 0x1d6   :  { %477 = vsyncpa [#allocation6], 1 }
 0x1d7   :  { %479 = vsyncpa [#allocation6 + $0x1], 1 }
 0x1d8   :  { %480 = vsyncpa [#allocation12], 1 }
 0x1d9   :  { %482 = vsyncpa [#allocation12 + $0x1], 1 }

</bundles_post_ra>
